<compile_context>
chip_gen: v5e
topology: v5e:2x2
jax: 0.10.0
libtpu: 0.0.40
codegen_flags: <defaults>
</compile_context>

<pallas_src>
import jax
import jax.numpy as jnp
from jax import lax
from jax.experimental import pallas as pl
from jax.experimental.pallas import tpu as pltpu

HIDDEN = 512
CLASSES = 16          # the reference module uses a global `classes`; pick 16
BATCH = 8
NEG_INF = -1e30       # finite on purpose: keeps exp()/where() NaN-free on pads
MAX_TILE_C = 4096     # bf16 weight tile, double-buffered: 2*4096*512*2B = 8 MiB
MAX_TILE_B = 256      # batch rows kept resident per grid step
VMEM_LIMIT = 48 * 1024 * 1024   # explicit scoped-VMEM budget (< 64 MiB v7x)


def _round_up(x, m):
    return (x + m - 1) // m * m


# --------------------------------------------------------------------------
# Fast path: the whole (padded) class axis fits in one tile -> one-pass
# log-softmax, no online accumulators.
# --------------------------------------------------------------------------
def arc_loss_single_tile_kernel(x_ref, w_ref, b_ref, t_ref, nll_ref):
    # x_ref: [TB, H] bf16, w_ref: [C_pad, H] bf16 (PyTorch layout, no transpose)
    # b_ref: [1, C_pad] f32 (-1e30 on padded classes), t_ref: [TB, 1] i32
    logits = lax.dot_general(
        x_ref[...], w_ref[...],
        dimension_numbers=(((1,), (1,)), ((), ())),
        preferred_element_type=jnp.float32) + b_ref[...]            # [TB, C_pad]

    m = jnp.max(logits, axis=-1, keepdims=True)
    lse = m + jnp.log(jnp.sum(jnp.exp(logits - m), axis=-1, keepdims=True))

    col = lax.broadcasted_iota(jnp.int32, logits.shape, 1)
    tgt = jnp.sum(jnp.where(col == t_ref[...], logits, 0.0),
                  axis=-1, keepdims=True)
    nll_ref[...] = lse - tgt


# --------------------------------------------------------------------------
# Streaming path: class axis tiled, online (flash-style) log-sum-exp.
# --------------------------------------------------------------------------
def arc_loss_stream_kernel(x_ref, w_ref, b_ref, t_ref, nll_ref,
                           m_sc, l_sc, tgt_sc):
    # x_ref:   [TB, H]   bf16 activations (resident across the class axis)
    # w_ref:   [TC, H]   bf16 fc.weight tile (PyTorch layout, no transpose)
    # b_ref:   [1, TC]   f32  bias tile (padded classes hold -1e30)
    # t_ref:   [TB, 1]   i32  integer targets
    # nll_ref: [TB, 1]   f32  per-sample NLL (written on the last class tile)
    # m_sc/l_sc/tgt_sc: [TB,1] f32 running max / sum-exp / target-logit accum.
    c = pl.program_id(1)

    @pl.when(c == 0)
    def _():
        m_sc[...] = jnp.full_like(m_sc, -jnp.inf)
        l_sc[...] = jnp.zeros_like(l_sc)
        tgt_sc[...] = jnp.zeros_like(tgt_sc)

    logits = lax.dot_general(
        x_ref[...], w_ref[...],
        dimension_numbers=(((1,), (1,)), ((), ())),
        preferred_element_type=jnp.float32) + b_ref[...]            # [TB, TC]

    # Online log-sum-exp across class tiles.  Every tile contains at least one
    # real class (c_pad = round_up(C, tile_c) guarantees it), so m_new is a
    # genuine finite logit and alpha never overflows.
    m_old = m_sc[...]
    m_new = jnp.maximum(m_old, jnp.max(logits, axis=-1, keepdims=True))
    alpha = jnp.exp(m_old - m_new)
    l_sc[...] = alpha * l_sc[...] + jnp.sum(jnp.exp(logits - m_new),
                                            axis=-1, keepdims=True)
    m_sc[...] = m_new

    # Target-class logit: offset the [TB,1] target (cheap) instead of the
    # [TB,TC] iota, and select with a single where/sum (no float one-hot).
    tc = logits.shape[1]
    col = lax.broadcasted_iota(jnp.int32, logits.shape, 1)
    t_local = t_ref[...] - c * tc                                   # [TB, 1]
    tgt_sc[...] += jnp.sum(jnp.where(col == t_local, logits, 0.0),
                           axis=-1, keepdims=True)

    @pl.when(c == pl.num_programs(1) - 1)
    def _():
        nll_ref[...] = m_sc[...] + jnp.log(l_sc[...]) - tgt_sc[...]


# --------------------------------------------------------------------------
# Parameter prep (one-time per parameter update): bf16 cast + lane padding.
# --------------------------------------------------------------------------
def prepare_params(weight, bias, max_tile_c=MAX_TILE_C):
    """weight: [C, H] (PyTorch nn.Linear layout), bias: [C].
    Returns (w_pad [C_pad, H] bf16, bias_pad [1, C_pad] f32, tile_c)."""
    C, _ = weight.shape
    tile_c = min(_round_up(C, 128), max_tile_c)
    c_pad = _round_up(C, tile_c)
    w_pad = jnp.pad(weight.astype(jnp.bfloat16), ((0, c_pad - C), (0, 0)))
    bias_pad = jnp.pad(bias.astype(jnp.float32), (0, c_pad - C),
                       constant_values=NEG_INF).reshape(1, c_pad)
    return w_pad, bias_pad, tile_c


def arc_loss(x, w_pad, bias_pad, target, tile_c):
    """x: [B, 512] f32, w_pad: [C_pad, 512] bf16 (PyTorch layout, padded
    classes), bias_pad: [1, C_pad] f32 (-1e30 on pads), target: [B] int.
    Returns scalar f32 mean cross-entropy loss."""
    B, H = x.shape
    c_pad = w_pad.shape[0]
    x = x.astype(jnp.bfloat16)

    # Keep the whole (padded) batch resident when possible so the weight is
    # streamed from HBM exactly once; tile only when B exceeds MAX_TILE_B.
    tile_b = min(_round_up(B, 8), MAX_TILE_B)
    bpad = _round_up(B, tile_b)
    if bpad != B:
        x = jnp.pad(x, ((0, bpad - B), (0, 0)))
        target = jnp.pad(target, (0, bpad - B))
    t2 = target.astype(jnp.int32).reshape(bpad, 1)

    num_b = bpad // tile_b
    num_c = c_pad // tile_c

    w_bytes = w_pad.size * w_pad.dtype.itemsize
    cost = pl.CostEstimate(
        flops=2 * bpad * H * c_pad,
        transcendentals=bpad * c_pad,
        bytes_accessed=int(w_bytes * num_b
                           + x.size * x.dtype.itemsize
                           + bias_pad.size * 4 + t2.size * 4 + bpad * 4),
    )

    if num_c == 1:
        # Small-C fast path (single class tile): no online-softmax machinery.
        nll = pl.pallas_call(
            arc_loss_single_tile_kernel,
            out_shape=jax.ShapeDtypeStruct((bpad, 1), jnp.float32),
            grid_spec=pltpu.PrefetchScalarGridSpec(
                num_scalar_prefetch=0,
                grid=(num_b,),
                in_specs=[
                    pl.BlockSpec((tile_b, H), lambda i: (i, 0)),     # x
                    pl.BlockSpec((tile_c, H), lambda i: (0, 0)),     # weight
                    pl.BlockSpec((1, tile_c), lambda i: (0, 0)),     # bias
                    pl.BlockSpec((tile_b, 1), lambda i: (i, 0)),     # targets
                ],
                out_specs=pl.BlockSpec((tile_b, 1), lambda i: (i, 0)),
            ),
            compiler_params=pltpu.CompilerParams(
                dimension_semantics=("parallel",),
                vmem_limit_bytes=VMEM_LIMIT),
            cost_estimate=cost,
        )(x, w_pad, bias_pad, t2)
    else:
        nll = pl.pallas_call(
            arc_loss_stream_kernel,
            out_shape=jax.ShapeDtypeStruct((bpad, 1), jnp.float32),
            grid_spec=pltpu.PrefetchScalarGridSpec(
                num_scalar_prefetch=0,
                grid=(num_b, num_c),
                in_specs=[
                    pl.BlockSpec((tile_b, H), lambda i, c: (i, 0)),  # x resident
                    pl.BlockSpec((tile_c, H), lambda i, c: (c, 0)),  # weight tile
                    pl.BlockSpec((1, tile_c), lambda i, c: (0, c)),  # bias tile
                    pl.BlockSpec((tile_b, 1), lambda i, c: (i, 0)),  # targets
                ],
                out_specs=pl.BlockSpec((tile_b, 1), lambda i, c: (i, 0)),
                scratch_shapes=[pltpu.VMEM((tile_b, 1), jnp.float32)] * 3,
            ),
            compiler_params=pltpu.CompilerParams(
                dimension_semantics=("parallel", "arbitrary"),
                vmem_limit_bytes=VMEM_LIMIT),
            cost_estimate=cost,
        )(x, w_pad, bias_pad, t2)

    return jnp.mean(nll[:B, 0])


def _ref_loss(x, weight, bias, target):
    logits = x @ weight.T.astype(jnp.float32) + bias.astype(jnp.float32)
    logp = jax.nn.log_softmax(logits, axis=-1)
    return -jnp.mean(logp[jnp.arange(x.shape[0]), target])


if __name__ == "__main__":
    key = jax.random.PRNGKey(0)
    kx, kw, kb, kt, kx2, kw2, kb2, kt2 = jax.random.split(key, 8)

    # ---- Test 1: the module's shapes (Linear(512, CLASSES)), fast path. ----
    x = jax.random.normal(kx, (BATCH, HIDDEN), dtype=jnp.float32)
    bound = 1.0 / (HIDDEN ** 0.5)  # mimic PyTorch Linear default init scale
    weight = jax.random.uniform(kw, (CLASSES, HIDDEN), jnp.float32, -bound, bound)
    bias = jax.random.uniform(kb, (CLASSES,), jnp.float32, -bound, bound)
    target = jax.random.randint(kt, (BATCH,), 0, CLASSES, dtype=jnp.int32)

    w_pad, bias_pad, tile_c = prepare_params(weight, bias)
    loss = jax.block_until_ready(arc_loss(x, w_pad, bias_pad, target, tile_c))
    ref = _ref_loss(x, weight, bias, target)
    # bf16 weights/activations (f32 accumulation) -> relaxed tolerance.
    assert jnp.allclose(loss, ref, atol=2e-2, rtol=2e-2), (loss, ref)

    # ---- Test 2: multi-class-tile streaming path (forced small tile_c). ----
    B2, C2 = 10, 300
    x2 = jax.random.normal(kx2, (B2, HIDDEN), dtype=jnp.float32)
    weight2 = jax.random.uniform(kw2, (C2, HIDDEN), jnp.float32, -bound, bound)
    bias2 = jax.random.uniform(kb2, (C2,), jnp.float32, -bound, bound)
    target2 = jax.random.randint(kt2, (B2,), 0, C2, dtype=jnp.int32)

    w_pad2, bias_pad2, tile_c2 = prepare_params(weight2, bias2, max_tile_c=128)
    loss2 = jax.block_until_ready(
        arc_loss(x2, w_pad2, bias_pad2, target2, tile_c2))
    ref2 = _ref_loss(x2, weight2, bias2, target2)
    assert jnp.allclose(loss2, ref2, atol=2e-2, rtol=2e-2), (loss2, ref2)

    print("KERNEL_OK")
</pallas_src>

<mosaic_0001>
module attributes {stable_mosaic.version = 11 : i64} {
  func.func @arc_loss_single_tile_kernel(%arg0: i32, %arg1: memref<8x512xbf16, #tpu.memory_space<vmem>>, %arg2: memref<128x512xbf16, #tpu.memory_space<vmem>>, %arg3: memref<1x128xf32, #tpu.memory_space<vmem>>, %arg4: memref<8x1xi32, #tpu.memory_space<vmem>>, %arg5: memref<8x1xf32, #tpu.memory_space<vmem>>) attributes {dimension_semantics = [#tpu.dimension_semantics<parallel>], iteration_bounds = array<i64: 1>, scalar_prefetch = 0 : i64, scratch_operands = 0 : i64, tpu.core_type = #tpu.core_type<tc>, window_params = [{transform_indices = @transform_0, window_bounds = array<i64: 8, 512>}, {pipeline_mode = #tpu.pipeline_mode<synchronous>, transform_indices = @transform_1, window_bounds = array<i64: 128, 512>}, {pipeline_mode = #tpu.pipeline_mode<synchronous>, transform_indices = @transform_2, window_bounds = array<i64: 1, 128>}, {transform_indices = @transform_3, window_bounds = array<i64: 8, 1>}, {transform_indices = @transform_4, window_bounds = array<i64: 8, 1>}]} {
    %c0 = arith.constant 0 : index
    %c0_0 = arith.constant 0 : index
    %0 = vector.load %arg1[%c0, %c0_0] : memref<8x512xbf16, #tpu.memory_space<vmem>>, vector<8x512xbf16>
    %c0_1 = arith.constant 0 : index
    %c0_2 = arith.constant 0 : index
    %1 = vector.load %arg2[%c0_1, %c0_2] : memref<128x512xbf16, #tpu.memory_space<vmem>>, vector<128x512xbf16>
    %cst = arith.constant dense<0.000000e+00> : vector<8x128xf32>
    %2 = tpu.matmul %0, %1, %cst {dimension_numbers = #tpu.dot_dimension_numbers<[1], [1], [0], [0], [0, 0, 1, 0], [], []>} : vector<8x512xbf16>, vector<128x512xbf16>, vector<8x128xf32> -> vector<8x128xf32>
    %c0_3 = arith.constant 0 : index
    %c0_4 = arith.constant 0 : index
    %3 = vector.load %arg3[%c0_3, %c0_4] : memref<1x128xf32, #tpu.memory_space<vmem>>, vector<1x128xf32>
    %4 = vector.broadcast %3 : vector<1x128xf32> to vector<8x128xf32>
    %5 = arith.addf %2, %4 : vector<8x128xf32>
    %cst_5 = arith.constant dense<0xFF800000> : vector<8xf32>
    %6 = vector.multi_reduction <maximumf>, %5, %cst_5 [1] : vector<8x128xf32> to vector<8xf32>
    %7 = vector.shape_cast %6 : vector<8xf32> to vector<8x1xf32>
    %8 = vector.broadcast %7 : vector<8x1xf32> to vector<8x128xf32>
    %9 = arith.subf %5, %8 : vector<8x128xf32>
    %10 = math.exp %9 : vector<8x128xf32>
    %cst_6 = arith.constant dense<0.000000e+00> : vector<8xf32>
    %11 = vector.multi_reduction <add>, %10, %cst_6 [1] : vector<8x128xf32> to vector<8xf32>
    %12 = vector.shape_cast %11 : vector<8xf32> to vector<8x1xf32>
    %13 = math.log %12 : vector<8x1xf32>
    %14 = arith.addf %7, %13 : vector<8x1xf32>
    %15 = tpu.iota {dimensions = array<i32: 1>} : vector<8x128xi32>
    %c0_7 = arith.constant 0 : index
    %c0_8 = arith.constant 0 : index
    %16 = vector.load %arg4[%c0_7, %c0_8] : memref<8x1xi32, #tpu.memory_space<vmem>>, vector<8x1xi32>
    %17 = vector.broadcast %16 : vector<8x1xi32> to vector<8x128xi32>
    %18 = arith.cmpi eq, %15, %17 : vector<8x128xi32>
    %cst_9 = arith.constant 0.000000e+00 : f32
    %19 = vector.broadcast %cst_9 : f32 to vector<8x128xf32>
    %20 = arith.select %18, %5, %19 : vector<8x128xi1>, vector<8x128xf32>
    %cst_10 = arith.constant dense<0.000000e+00> : vector<8xf32>
    %21 = vector.multi_reduction <add>, %20, %cst_10 [1] : vector<8x128xf32> to vector<8xf32>
    %22 = vector.shape_cast %21 : vector<8xf32> to vector<8x1xf32>
    %23 = arith.subf %14, %22 : vector<8x1xf32>
    %c0_11 = arith.constant 0 : index
    %c0_12 = arith.constant 0 : index
    %24 = vector.load %arg5[%c0_11, %c0_12] : memref<8x1xf32, #tpu.memory_space<vmem>>, vector<8x1xf32>
    tpu.vector_store %arg5[%c0_11, %c0_12], %23 {strides = array<i32>} : memref<8x1xf32, #tpu.memory_space<vmem>>, vector<8x1xf32>,
    return
  }
  func.func @transform_0(%arg0: i32) -> (i32, i32) {
    %c0_i32 = arith.constant 0 : i32
    %c0_i32_0 = arith.constant 0 : i32
    return %arg0, %c0_i32 : i32, i32
  }
  func.func @transform_1(%arg0: i32) -> (i32, i32) {
    %c0_i32 = arith.constant 0 : i32
    %c0_i32_0 = arith.constant 0 : i32
    %c0_i32_1 = arith.constant 0 : i32
    return %c0_i32, %c0_i32_0 : i32, i32
  }
  func.func @transform_2(%arg0: i32) -> (i32, i32) {
    %c0_i32 = arith.constant 0 : i32
    %c0_i32_0 = arith.constant 0 : i32
    %c0_i32_1 = arith.constant 0 : i32
    return %c0_i32, %c0_i32_0 : i32, i32
  }
  func.func @transform_3(%arg0: i32) -> (i32, i32) {
    %c0_i32 = arith.constant 0 : i32
    %c0_i32_0 = arith.constant 0 : i32
    return %arg0, %c0_i32 : i32, i32
  }
  func.func @transform_4(%arg0: i32) -> (i32, i32) {
    %c0_i32 = arith.constant 0 : i32
    %c0_i32_0 = arith.constant 0 : i32
    return %arg0, %c0_i32 : i32, i32
  }
}

</mosaic_0001>

<bundles_post_ra>
// kernel: tpu_custom_call.1
= control target key start
LH: loop header
LB: loop body
LE: loop exit
PB: predicated region body
PF: predicated region fallthrough
CT: control target
= control target key end

     0   :  { %9 = vsyncpa [#allocation3], 0  ;;  %s608_s0 = inlined_call_operand.hbm [shape: bf16[8,512], index: 0, kind: input, shape index: {}]   ;;  %s609_s1 = inlined_call_operand.hbm [shape: bf16[128,512], index: 1, kind: input, shape index: {}]   ;;  %s610_s2 = inlined_call_operand.vmem [shape: f32[1,128], index: 2, kind: input, shape index: {}]   ;;  %s611_s3 = inlined_call_operand.vmem [shape: s32[8,1], index: 3, kind: input, shape index: {}]   ;;  %s612_s4 = inlined_call_operand.vmem [shape: f32[8,1], index: 4, kind: output, shape index: {}]  }
   0x1   :  { %s16_s17 = sshll.u32 %s608_s0, 4  ;;  %s17_s17 = int_to_ptr.hbm [resolvable:$true] %s16_s17 }
   0x2   :  { %10 = vsyncpa [#allocation5], 0  ;;  %s563_s18 = smov [#allocation2]   ;;  %s26_s22 = sshll.u32 %s609_s1, 4  ;;  %s27_s22 = int_to_ptr.hbm [resolvable:$true] %s26_s22 }
   0x3   :  { %s18_s19 = sshll.u32 %s563_s18, 4  ;;  %s564_s23 = smov [#allocation4]   ;;  %s19_s19 = int_to_ptr.vmem [resolvable:$true] %s18_s19 }
   0x4   :  { %21 = dma.hbm_to_vmem [thread:$0]  %s17_s17, 256, %s19_s19, [#allocation3]  }
   0x5   :  { %s28_s24 = sshll.u32 %s564_s23, 4  ;;  %s565_s25 = smov 256   ;;  %s29_s24 = int_to_ptr.vmem [resolvable:$true] %s28_s24 }
   0x6   :  { %s566_s26 = smov 16  }
   0x7   :  { %34 = dma.hbm_to_vmem [thread:$0]  %s27_s22, 4096, %s29_s24, [#allocation5], %s565_s25, %s565_s25, %s566_s26  }
   0x8   :  { %559 = dma.done.wait [#allocation3], 256  }
   0x9   :  { %560 = vsyncadd [#allocation3], 4294967040 }
   0xa   :  { %561 = dma.done.wait [#allocation5], 4096  }
   0xb   :  { %562 = vsyncadd [#allocation5], 4294963200  ;;  %v454_v0 = vld [vmem:[#allocation4 + $0xe0] sm:$0xf]  ;;  %v498_v1 = vld [vmem:[#allocation4 + $0xec] sm:$0xf0] }
   0xc   :  { %v496_v2 = vld [vmem:[#allocation4 + $0xe4] sm:$0xf]  ;;  %v455_v3 = vor.u32 %v498_v1, %v454_v0  ;;  %v456_v4 = vld [vmem:[#allocation4 + $0xf0] sm:$0xf0]  ;;  %v462_v5 = vld [vmem:[#allocation4 + $0xe8] sm:$0xf] }
   0xd   :  { %v499_v6 = vld [vmem:[#allocation4 + $0xf4] sm:$0xf0]  ;;  %v459_v7 = vor.u32 %v496_v2, %v456_v4  ;;  %v497_v9 = vld [vmem:[#allocation4 + $0xec] sm:$0xf]  ;;  %v464_v10 = vld [vmem:[#allocation4 + $0xf8] sm:$0xf0] }
   0xe   :  { %v463_v8 = vor.u32 %v499_v6, %v462_v5  ;;  %259 = vmatpush.bf16.xpose.msra.mxu0 %v455_v3  ;;  %v467_v11 = vor.u32 %v497_v9, %v464_v10  ;;  %v438_v12 = vld [vmem:[#allocation4 + $0xc0] sm:$0xf]  ;;  %v494_v13 = vld [vmem:[#allocation4 + $0xcc] sm:$0xf0]  ;;  %v492_v14 = vld [vmem:[#allocation4 + $0xc4] sm:$0xf] }
   0xf   :  { %272 = vmatpush.bf16.xpose.msra.mxu1 %v459_v7  ;;  %v440_v15 = vld [vmem:[#allocation4 + $0xd0] sm:$0xf0]  ;;  %v446_v16 = vld [vmem:[#allocation4 + $0xc8] sm:$0xf]  ;;  %v495_v17 = vld [vmem:[#allocation4 + $0xd4] sm:$0xf0]  ;;  %v439_v20 = vor.u32 %v494_v13, %v438_v12 }
  0x10   :  { %285 = vmatpush.bf16.xpose.msra.mxu2 %v463_v8  ;;  %298 = vmatpush.bf16.xpose.msra.mxu3 %v467_v11  ;;  %v493_v18 = vld [vmem:[#allocation4 + $0xcc] sm:$0xf]  ;;  %v448_v19 = vld [vmem:[#allocation4 + $0xd8] sm:$0xf0]  ;;  %v443_v21 = vor.u32 %v492_v14, %v440_v15  ;;  %v447_v22 = vor.u32 %v495_v17, %v446_v16  ;;  %v422_v24 = vld [vmem:[#allocation4 + $0xa0] sm:$0xf] }
  0x11   :  { %v451_v23 = vor.u32 %v493_v18, %v448_v19  ;;  %v490_v25 = vld [vmem:[#allocation4 + $0xac] sm:$0xf0]  ;;  %v488_v26 = vld [vmem:[#allocation4 + $0xa4] sm:$0xf]  ;;  %v424_v27 = vld [vmem:[#allocation4 + $0xb0] sm:$0xf0] }
  0x12   :  { %v430_v28 = vld [vmem:[#allocation4 + $0xa8] sm:$0xf]  ;;  %v491_v29 = vld [vmem:[#allocation4 + $0xb4] sm:$0xf0]  ;;  %v489_v30 = vld [vmem:[#allocation4 + $0xac] sm:$0xf]  ;;  %v423_v32 = vor.u32 %v490_v25, %v422_v24  ;;  %v427_v33 = vor.u32 %v488_v26, %v424_v27 }
  0x13   :  { %v432_v31 = vld [vmem:[#allocation4 + $0xb8] sm:$0xf0]  ;;  %v431_v34 = vor.u32 %v491_v29, %v430_v28  ;;  %v406_v36 = vld [vmem:[#allocation4 + $0x80] sm:$0xf]  ;;  %v486_v37 = vld [vmem:[#allocation4 + $0x8c] sm:$0xf0] }
  0x14   :  { %v435_v35 = vor.u32 %v489_v30, %v432_v31  ;;  %v484_v38 = vld [vmem:[#allocation4 + $0x84] sm:$0xf]  ;;  %v408_v39 = vld [vmem:[#allocation4 + $0x90] sm:$0xf0]  ;;  %v414_v40 = vld [vmem:[#allocation4 + $0x88] sm:$0xf]  ;;  %v407_v44 = vor.u32 %v486_v37, %v406_v36 }
  0x15   :  { %v487_v41 = vld [vmem:[#allocation4 + $0x94] sm:$0xf0]  ;;  %v485_v42 = vld [vmem:[#allocation4 + $0x8c] sm:$0xf]  ;;  %v416_v43 = vld [vmem:[#allocation4 + $0x98] sm:$0xf0]  ;;  %v411_v45 = vor.u32 %v484_v38, %v408_v39 }
  0x16   :  { %260 = vmatpush.bf16.xpose.msra.mxu0 %v439_v20  ;;  %v415_v46 = vor.u32 %v487_v41, %v414_v40  ;;  %v419_v47 = vor.u32 %v485_v42, %v416_v43  ;;  %v390_v48 = vld [vmem:[#allocation4 + $0x60] sm:$0xf]  ;;  %v482_v49 = vld [vmem:[#allocation4 + $0x6c] sm:$0xf0]  ;;  %v480_v50 = vld [vmem:[#allocation4 + $0x64] sm:$0xf] }
  0x17   :  { %273 = vmatpush.bf16.xpose.msra.mxu1 %v443_v21  ;;  %v392_v51 = vld [vmem:[#allocation4 + $0x70] sm:$0xf0]  ;;  %v398_v52 = vld [vmem:[#allocation4 + $0x68] sm:$0xf]  ;;  %v483_v53 = vld [vmem:[#allocation4 + $0x74] sm:$0xf0]  ;;  %v391_v56 = vor.u32 %v482_v49, %v390_v48 }
  0x18   :  { %286 = vmatpush.bf16.xpose.msra.mxu2 %v447_v22  ;;  %299 = vmatpush.bf16.xpose.msra.mxu3 %v451_v23  ;;  %v481_v54 = vld [vmem:[#allocation4 + $0x6c] sm:$0xf]  ;;  %v400_v55 = vld [vmem:[#allocation4 + $0x78] sm:$0xf0]  ;;  %v395_v57 = vor.u32 %v480_v50, %v392_v51  ;;  %v399_v58 = vor.u32 %v483_v53, %v398_v52  ;;  %v374_v60 = vld [vmem:[#allocation4 + $0x40] sm:$0xf] }
  0x19   :  { %v403_v59 = vor.u32 %v481_v54, %v400_v55  ;;  %v478_v61 = vld [vmem:[#allocation4 + $0x4c] sm:$0xf0]  ;;  %v476_v62 = vld [vmem:[#allocation4 + $0x44] sm:$0xf]  ;;  %v376_v63 = vld [vmem:[#allocation4 + $0x50] sm:$0xf0] }
  0x1a   :  { %v382_v0 = vld [vmem:[#allocation4 + $0x48] sm:$0xf]  ;;  %v479_v1 = vld [vmem:[#allocation4 + $0x54] sm:$0xf0]  ;;  %v477_v2 = vld [vmem:[#allocation4 + $0x4c] sm:$0xf]  ;;  %v375_v4 = vor.u32 %v478_v61, %v374_v60  ;;  %v379_v5 = vor.u32 %v476_v62, %v376_v63  ;;  %v321_v61 = vlaneseq }
  0x1b   :  { %v384_v3 = vld [vmem:[#allocation4 + $0x58] sm:$0xf0]  ;;  %v383_v6 = vor.u32 %v479_v1, %v382_v0  ;;  %v358_v8 = vld [vmem:[#allocation4 + $0x20] sm:$0xf]  ;;  %v474_v9 = vld [vmem:[#allocation4 + $0x2c] sm:$0xf0] }
  0x1c   :  { %v387_v7 = vor.u32 %v477_v2, %v384_v3  ;;  %v472_v10 = vld [vmem:[#allocation4 + $0x24] sm:$0xf]  ;;  %v360_v11 = vld [vmem:[#allocation4 + $0x30] sm:$0xf0]  ;;  %v366_v12 = vld [vmem:[#allocation4 + $0x28] sm:$0xf]  ;;  %v359_v16 = vor.u32 %v474_v9, %v358_v8 }
  0x1d   :  { %v475_v13 = vld [vmem:[#allocation4 + $0x34] sm:$0xf0]  ;;  %v473_v14 = vld [vmem:[#allocation4 + $0x2c] sm:$0xf]  ;;  %v368_v15 = vld [vmem:[#allocation4 + $0x38] sm:$0xf0]  ;;  %v363_v17 = vor.u32 %v472_v10, %v360_v11 }
  0x1e   :  { %261 = vmatpush.bf16.xpose.msra.mxu0 %v423_v32  ;;  %v367_v18 = vor.u32 %v475_v13, %v366_v12  ;;  %v371_v19 = vor.u32 %v473_v14, %v368_v15  ;;  %v342_v20 = vld [vmem:[#allocation4] sm:$0xf]  ;;  %v470_v21 = vld [vmem:[#allocation4 + $0xc] sm:$0xf0]  ;;  %v468_v22 = vld [vmem:[#allocation4 + $0x4] sm:$0xf] }
  0x1f   :  { %274 = vmatpush.bf16.xpose.msra.mxu1 %v427_v33  ;;  %v344_v23 = vld [vmem:[#allocation4 + $0x10] sm:$0xf0]  ;;  %v350_v24 = vld [vmem:[#allocation4 + $0x8] sm:$0xf]  ;;  %v471_v25 = vld [vmem:[#allocation4 + $0x14] sm:$0xf0]  ;;  %v343_v28 = vor.u32 %v470_v21, %v342_v20 }
  0x20   :  { %287 = vmatpush.bf16.xpose.msra.mxu2 %v431_v34  ;;  %300 = vmatpush.bf16.xpose.msra.mxu3 %v435_v35  ;;  %v469_v26 = vld [vmem:[#allocation4 + $0xc] sm:$0xf]  ;;  %v352_v27 = vld [vmem:[#allocation4 + $0x18] sm:$0xf0]  ;;  %v47_v29 = vld [vmem:[#allocation2] sm:$0xff]  ;;  %v347_v30 = vor.u32 %v468_v22, %v344_v23  ;;  %v351_v31 = vor.u32 %v471_v25, %v350_v24  ;;  %v567_v42 = vmov 0  }
  0x21   :  { %v48_v32 = vld [vmem:[#allocation2 + $0x8] sm:$0xff]  ;;  %v355_v33 = vor.u32 %v469_v26, %v352_v27  ;;  %v87_v34 = vunpack.c.l.b16 %v47_v29  ;;  %v88_v35 = vunpack.c.h.b16 %v47_v29  ;;  %505 = vset.pattern.permute.xlu0 %v567_v42  ;;  %v506_v43 = vld [vmem:[%s610_s2] ss:$0 sm:$0xff]  ;;  %v322_v62 = vand.u32 127, %v321_v61 }
  0x22   :  { %v89_v36 = vunpack.c.l.b16 %v48_v32  ;;  %v90_v37 = vunpack.c.h.b16 %v48_v32  ;;  %vm332_vm1 = vcmask 7168  }
  0x23   :  { %v91_v38 = vpack.c.b16 %v87_v34, %v87_v34  ;;  %v92_v39 = vpack.c.b16 %v88_v35, %v88_v35 }
  0x24   :  { %v93_v40 = vpack.c.b16 %v89_v36, %v89_v36  ;;  %v94_v41 = vpack.c.b16 %v90_v37, %v90_v37 }
  0x26   :  { %262 = vmatpush.bf16.xpose.msra.mxu0 %v407_v44 }
  0x27   :  { %275 = vmatpush.bf16.xpose.msra.mxu1 %v411_v45 }
  0x28   :  { %288 = vmatpush.bf16.xpose.msra.mxu2 %v415_v46  ;;  %301 = vmatpush.bf16.xpose.msra.mxu3 %v419_v47 }
  0x2e   :  { %263 = vmatpush.bf16.xpose.msra.mxu0 %v391_v56  ;;  %v323_v56 = vld [vmem:[%s611_s3] sm:$0xff] }
  0x2f   :  { %276 = vmatpush.bf16.xpose.msra.mxu1 %v395_v57 }
  0x30   :  { %289 = vmatpush.bf16.xpose.msra.mxu2 %v399_v58  ;;  %302 = vmatpush.bf16.xpose.msra.mxu3 %v403_v59 }
  0x36   :  { %264 = vmatpush.bf16.xpose.msra.mxu0 %v375_v4 }
  0x37   :  { %277 = vmatpush.bf16.xpose.msra.mxu1 %v379_v5 }
  0x38   :  { %290 = vmatpush.bf16.xpose.msra.mxu2 %v383_v6  ;;  %303 = vmatpush.bf16.xpose.msra.mxu3 %v387_v7 }
  0x3e   :  { %265 = vmatpush.bf16.xpose.msra.mxu0 %v359_v16 }
  0x3f   :  { %278 = vmatpush.bf16.xpose.msra.mxu1 %v363_v17 }
  0x40   :  { %291 = vmatpush.bf16.xpose.msra.mxu2 %v367_v18  ;;  %304 = vmatpush.bf16.xpose.msra.mxu3 %v371_v19 }
  0x46   :  { %266 = vmatpush.bf16.xpose.msra.mxu0 %v343_v28 }
  0x47   :  { %279 = vmatpush.bf16.xpose.msra.mxu1 %v347_v30 }
  0x48   :  { %292 = vmatpush.bf16.xpose.msra.mxu2 %v351_v31  ;;  %305 = vmatpush.bf16.xpose.msra.mxu3 %v355_v33 }
  0x4d   :  { %267 = vmatmul.bf16.vlgmr.msra.gmra.mxu0 %v91_v38 }
  0x4e   :  { %280 = vmatmul.bf16.vlgmr.msra.gmra.mxu1 %v92_v39 }
  0x4f   :  { %293 = vmatmul.bf16.vlgmr.msra.gmra.mxu2 %v93_v40  ;;  %306 = vmatmul.bf16.vlgmr.msra.gmra.mxu3 %v94_v41 }
  0xca   :  { %v268_v44 = vpop.f32.mrf.mxu0 }
  0xcb   :  { %v269_v45 = vadd.f32 %v506_v43, %v268_v44  ;;  %v281_v46 = vpop.f32.mrf.mxu1 }
  0xcd   :  { %v282_v47 = vadd.f32 %v281_v46, %v269_v45 }
  0xd2   :  { %v294_v48 = vpop.f32.mrf.mxu2  ;;  %v307_v50 = vpop.f32.mrf.mxu3 }
  0xd3   :  { %v295_v49 = vadd.f32 %v294_v48, %v282_v47  ;;  %v270_v51 = vpop.f32.mrf.mxu0  ;;  %v283_v52 = vpop.f32.mrf.mxu1 }
  0xd5   :  { %v308_v53 = vadd.f32 %v307_v50, %v295_v49 }
  0xd7   :  { %311 = vmax.xlane.f32.xlu0 %v308_v53 }
  0xda   :  { %v296_v54 = vpop.f32.mrf.mxu2  ;;  %v309_v55 = vpop.f32.mrf.mxu3 }
  0xeb   :  { %325 = vperm.xlu0 %505, %v323_v56  }
 0x14a   :  { %v312_v57 = vpop.xlane.xlu0 %311 }
 0x14b   :  { %v313_v58 = vsub.f32 %v308_v53, %v312_v57 }
 0x14d   :  { %v314_v59 = vmul.f32 1.442695, %v313_v58 }
 0x14f   :  { %507 = vpow2.f32 %v314_v59 }
 0x155   :  { %v508_v60 = vpop.eup %507 }
 0x156   :  { %316 = vadd.xlane.f32.xlu1 %v508_v60 }
 0x15d   :  { %v326_v63 = vpop.permute.xlu0 %325 }
 0x15e   :  { %vm327_vm0 = vcmp.eq.s32.totalorder %v322_v62, %v326_v63 }
 0x15f   :  { %v328_v0 = vsel %vm327_vm0, %v308_v53, 0.0 }
 0x160   :  { %329 = vadd.xlane.f32.xlu1 %v328_v0 }
 0x1c9   :  { %v317_v1 = vpop.xlane.xlu1 %316 }
 0x1ca   :  { %509 = vlog2.f32 %v317_v1 }
 0x1d0   :  { %v510_v2 = vpop.eup %509 }
 0x1d1   :  { %v319_v3 = vmul.f32 0.6931472, %v510_v2 }
 0x1d3   :  { %v320_v4 = vadd.f32 %v319_v3, %v312_v57  ;;  %v330_v5 = vpop.xlane.xlu1 %329 }
 0x1d5   :  { %v331_v6 = vsub.f32 %v320_v4, %v330_v5 }
 0x1d7   :  { %333 = vst.msk [vmem:[%s612_s4] sm:$0xff] %vm332_vm1, %v331_v6 }
 0x1d8   :  { %338 = vsyncpa [#allocation3], 1 }
 0x1d9   :  { %339 = vsyncpa [#allocation5], 1 }

</bundles_post_ra>
